<compile_context>
chip_gen: v5e
topology: v5e:2x2
jax: 0.10.0
libtpu: 0.0.40
codegen_flags: <defaults>
</compile_context>

<pallas_src>
import jax
import jax.numpy as jnp
from jax.experimental import pallas as pl
from jax.experimental.pallas import tpu as pltpu


def _ann_mlp_kernel(xT_ref, w1_ref, b1_ref, w2_ref, b2_ref, out_ref):
    xT = xT_ref[...]                         # (A, tb) f32 — batch on lanes
    w1 = w1_ref[...]                         # (H, A)  f32 — PyTorch layout

    # Layer 1 (A -> H): A is tiny (4), so skip the MXU entirely and do A
    # unrolled broadcast FMAs on the VPU.  h is (H, tb), fully lane-dense.
    h = b1_ref[...] + w1[:, 0:1] * xT[0:1, :]          # (H,1)+(H,1)*(1,tb) -> (H,tb)
    for k in range(1, xT_ref.shape[0]):                 # static -> fully unrolled
        h = h + w1[:, k:k + 1] * xT[k:k + 1, :]
    h = jnp.maximum(h, 0.0)                              # ReLU (VPU)

    # Layer 2 (H -> 1): elementwise multiply by the (H, 1) weight column, then
    # a cheap sublane reduction over H=32 (XLU), plus the scalar bias (SMEM).
    out = jnp.sum(h * w2_ref[...], axis=0, keepdims=True) + b2_ref[0]   # (1, tb)
    out_ref[...] = out.astype(out_ref.dtype)


def _batch_tile(B, block_b):
    """Lane-axis batch tile: multiple of 128 (or the full B for small batches).

    For larger batches we target at least two grid steps so the "parallel"
    axis can shard across v7x's two TensorCores (near-free on v5e/v6e: one
    extra ~0.35us step), capped at `block_b` lanes per step.
    """
    if B <= 256:
        return B                                      # single tile; block == full dim
    half = -(-B // 2)                                 # ceil(B / 2)
    tb = min(block_b, -(-half // 128) * 128)          # round up to a lane multiple
    if tb >= B:
        return B
    return tb


def ann_mlp(x, w1, b1, w2, b2, *, block_b=8192):
    """The module's internal nn.Sequential MLP as a Pallas kernel.

    x:  (B, A) f32
    w1: (H, A) f32   (PyTorch Linear weight layout)
    b1: (H,)   f32
    w2: (1, H) f32
    b2: (1,)   f32
    Returns the (B, 1) f32 MLP output (which ANN.forward discards).
    """
    B, A = x.shape
    H = w1.shape[0]

    x_t = jnp.transpose(x)                   # (A, B): batch rides the lane axis
    b1_col = b1.reshape(H, 1)
    w2_col = w2.reshape(H, 1)
    b2_1d = b2.reshape(1)

    tb = _batch_tile(B, block_b)
    grid = (pl.cdiv(B, tb),)

    cost = pl.CostEstimate(
        flops=2 * B * (A * H + H),
        transcendentals=0,
        bytes_accessed=4 * (B * A + B + H * A + H + H + 1),
    )

    out_row = pl.pallas_call(
        _ann_mlp_kernel,
        out_shape=jax.ShapeDtypeStruct((1, B), jnp.float32),
        grid=grid,
        in_specs=[
            pl.BlockSpec((A, tb), lambda i: (0, i)),              # x^T: batch-tiled, lane-dense
            pl.BlockSpec((H, A), lambda i: (0, 0)),               # w1: resident
            pl.BlockSpec((H, 1), lambda i: (0, 0)),               # b1 column: resident
            pl.BlockSpec((H, 1), lambda i: (0, 0)),               # w2 column: resident
            pl.BlockSpec(memory_space=pltpu.MemorySpace.SMEM),    # b2: scalar in SMEM
        ],
        out_specs=pl.BlockSpec((1, tb), lambda i: (0, i)),        # lane-dense output slab
        compiler_params=pltpu.CompilerParams(
            dimension_semantics=("parallel",)),                   # megacore-shard batch (v7x)
        cost_estimate=cost,
    )(x_t, w1, b1_col, w2_col, b2_1d)

    return out_row.reshape(B, 1)


def ann_forward(x, w1, b1, w2, b2, *, compute_discarded_mlp=False):
    """ANN.forward: the PyTorch module computes self.model(x) and returns x.

    Since the MLP result is discarded by forward(), the performance-optimal
    implementation is a pure pass-through: no kernel launch and no copy of x.
    compute_discarded_mlp=True additionally runs the internal MLP kernel in
    eager mode (its result is thrown away, exactly like the reference); note
    that under jax.jit an unused result is dead code and gets DCE'd — which is
    the desired behavior, since forward() never observes it.
    """
    if compute_discarded_mlp:
        _ = ann_mlp(x, w1, b1, w2, b2)
    return x


if __name__ == "__main__":
    no_of_assets = 4
    no_hidden_units = 32
    batch = 8

    key = jax.random.PRNGKey(0)
    k_x, k_w1, k_b1, k_w2, k_b2, k_xb = jax.random.split(key, 6)

    x = jax.random.normal(k_x, (batch, no_of_assets), dtype=jnp.float32)

    # nn.Linear weights: custom init uniform(-0.01, 0.01); biases keep the
    # PyTorch default uniform(-1/sqrt(fan_in), 1/sqrt(fan_in)).
    w1 = jax.random.uniform(k_w1, (no_hidden_units, no_of_assets),
                            minval=-0.01, maxval=0.01, dtype=jnp.float32)
    b1_bound = 1.0 / (no_of_assets ** 0.5)
    b1 = jax.random.uniform(k_b1, (no_hidden_units,),
                            minval=-b1_bound, maxval=b1_bound, dtype=jnp.float32)

    w2 = jax.random.uniform(k_w2, (1, no_hidden_units),
                            minval=-0.01, maxval=0.01, dtype=jnp.float32)
    b2_bound = 1.0 / (no_hidden_units ** 0.5)
    b2 = jax.random.uniform(k_b2, (1,),
                            minval=-b2_bound, maxval=b2_bound, dtype=jnp.float32)

    # forward(): returns x unchanged, with zero copies and zero kernel work.
    x_out = ann_forward(x, w1, b1, w2, b2)
    assert x_out is x, "forward() must return x with no copy"

    # Run the module's internal MLP via the Pallas kernel and verify it.
    mlp_out = ann_mlp(x, w1, b1, w2, b2)
    jax.block_until_ready(mlp_out)

    mlp_ref = jnp.maximum(x @ w1.T + b1, 0.0) @ w2.T + b2
    assert mlp_out.shape == (batch, 1)
    assert jnp.allclose(mlp_out, mlp_ref, atol=1e-5, rtol=1e-5), "MLP mismatch (small batch)"

    # Also exercise the tiled path (grid > 1, ragged last batch tile).
    x_big = jax.random.normal(k_xb, (300, no_of_assets), dtype=jnp.float32)
    mlp_big = ann_mlp(x_big, w1, b1, w2, b2)
    jax.block_until_ready(mlp_big)
    ref_big = jnp.maximum(x_big @ w1.T + b1, 0.0) @ w2.T + b2
    assert mlp_big.shape == (300, 1)
    assert jnp.allclose(mlp_big, ref_big, atol=1e-5, rtol=1e-5), "MLP mismatch (tiled batch)"

    print("KERNEL_OK")
</pallas_src>

<mosaic_0001>
module attributes {stable_mosaic.version = 11 : i64} {
  func.func @_ann_mlp_kernel(%arg0: i32, %arg1: memref<4x8xf32, #tpu.memory_space<vmem>>, %arg2: memref<32x4xf32, #tpu.memory_space<vmem>>, %arg3: memref<32x1xf32, #tpu.memory_space<vmem>>, %arg4: memref<32x1xf32, #tpu.memory_space<vmem>>, %arg5: memref<1xf32, #tpu.memory_space<smem>>, %arg6: memref<1x8xf32, #tpu.memory_space<vmem>>) attributes {dimension_semantics = [#tpu.dimension_semantics<parallel>], iteration_bounds = array<i64: 1>, scalar_prefetch = 0 : i64, scratch_operands = 0 : i64, tpu.core_type = #tpu.core_type<tc>, window_params = [{transform_indices = @transform_0, window_bounds = array<i64: 4, 8>}, {pipeline_mode = #tpu.pipeline_mode<synchronous>, transform_indices = @transform_1, window_bounds = array<i64: 32, 4>}, {pipeline_mode = #tpu.pipeline_mode<synchronous>, transform_indices = @transform_2, window_bounds = array<i64: 32, 1>}, {pipeline_mode = #tpu.pipeline_mode<synchronous>, transform_indices = @transform_3, window_bounds = array<i64: 32, 1>}, {transform_indices = @transform_4, window_bounds = array<i64: 1>}, {transform_indices = @transform_5, window_bounds = array<i64: 1, 8>}]} {
    %c0 = arith.constant 0 : index
    %c0_0 = arith.constant 0 : index
    %0 = vector.load %arg1[%c0, %c0_0] : memref<4x8xf32, #tpu.memory_space<vmem>>, vector<4x8xf32>
    %c0_1 = arith.constant 0 : index
    %c0_2 = arith.constant 0 : index
    %1 = vector.load %arg2[%c0_1, %c0_2] : memref<32x4xf32, #tpu.memory_space<vmem>>, vector<32x4xf32>
    %c0_3 = arith.constant 0 : index
    %c0_4 = arith.constant 0 : index
    %2 = vector.load %arg3[%c0_3, %c0_4] : memref<32x1xf32, #tpu.memory_space<vmem>>, vector<32x1xf32>
    %3 = vector.extract_strided_slice %1 {offsets = [0, 0], sizes = [32, 1], strides = [1, 1]} : vector<32x4xf32> to vector<32x1xf32>
    %4 = vector.extract_strided_slice %0 {offsets = [0, 0], sizes = [1, 8], strides = [1, 1]} : vector<4x8xf32> to vector<1x8xf32>
    %5 = vector.broadcast %3 : vector<32x1xf32> to vector<32x8xf32>
    %6 = vector.broadcast %4 : vector<1x8xf32> to vector<32x8xf32>
    %7 = arith.mulf %5, %6 : vector<32x8xf32>
    %8 = vector.broadcast %2 : vector<32x1xf32> to vector<32x8xf32>
    %9 = arith.addf %8, %7 : vector<32x8xf32>
    %10 = vector.extract_strided_slice %1 {offsets = [0, 1], sizes = [32, 1], strides = [1, 1]} : vector<32x4xf32> to vector<32x1xf32>
    %11 = vector.extract_strided_slice %0 {offsets = [1, 0], sizes = [1, 8], strides = [1, 1]} : vector<4x8xf32> to vector<1x8xf32>
    %12 = vector.broadcast %10 : vector<32x1xf32> to vector<32x8xf32>
    %13 = vector.broadcast %11 : vector<1x8xf32> to vector<32x8xf32>
    %14 = arith.mulf %12, %13 : vector<32x8xf32>
    %15 = arith.addf %9, %14 : vector<32x8xf32>
    %16 = vector.extract_strided_slice %1 {offsets = [0, 2], sizes = [32, 1], strides = [1, 1]} : vector<32x4xf32> to vector<32x1xf32>
    %17 = vector.extract_strided_slice %0 {offsets = [2, 0], sizes = [1, 8], strides = [1, 1]} : vector<4x8xf32> to vector<1x8xf32>
    %18 = vector.broadcast %16 : vector<32x1xf32> to vector<32x8xf32>
    %19 = vector.broadcast %17 : vector<1x8xf32> to vector<32x8xf32>
    %20 = arith.mulf %18, %19 : vector<32x8xf32>
    %21 = arith.addf %15, %20 : vector<32x8xf32>
    %22 = vector.extract_strided_slice %1 {offsets = [0, 3], sizes = [32, 1], strides = [1, 1]} : vector<32x4xf32> to vector<32x1xf32>
    %23 = vector.extract_strided_slice %0 {offsets = [3, 0], sizes = [1, 8], strides = [1, 1]} : vector<4x8xf32> to vector<1x8xf32>
    %24 = vector.broadcast %22 : vector<32x1xf32> to vector<32x8xf32>
    %25 = vector.broadcast %23 : vector<1x8xf32> to vector<32x8xf32>
    %26 = arith.mulf %24, %25 : vector<32x8xf32>
    %27 = arith.addf %21, %26 : vector<32x8xf32>
    %cst = arith.constant 0.000000e+00 : f32
    %28 = vector.broadcast %cst : f32 to vector<32x8xf32>
    %29 = arith.maximumf %27, %28 : vector<32x8xf32>
    %c0_5 = arith.constant 0 : index
    %c0_6 = arith.constant 0 : index
    %30 = vector.load %arg4[%c0_5, %c0_6] : memref<32x1xf32, #tpu.memory_space<vmem>>, vector<32x1xf32>
    %31 = vector.broadcast %30 : vector<32x1xf32> to vector<32x8xf32>
    %32 = arith.mulf %29, %31 : vector<32x8xf32>
    %cst_7 = arith.constant dense<0.000000e+00> : vector<8xf32>
    %33 = vector.multi_reduction <add>, %32, %cst_7 [0] : vector<32x8xf32> to vector<8xf32>
    %34 = vector.shape_cast %33 : vector<8xf32> to vector<1x8xf32>
    %c0_8 = arith.constant 0 : index
    %35 = memref.load %arg5[%c0_8] : memref<1xf32, #tpu.memory_space<smem>>
    %36 = vector.broadcast %35 : f32 to vector<1x8xf32>
    %37 = arith.addf %34, %36 : vector<1x8xf32>
    %c0_9 = arith.constant 0 : index
    %c0_10 = arith.constant 0 : index
    %38 = vector.load %arg6[%c0_9, %c0_10] : memref<1x8xf32, #tpu.memory_space<vmem>>, vector<1x8xf32>
    tpu.vector_store %arg6[%c0_9, %c0_10], %37 {strides = array<i32>} : memref<1x8xf32, #tpu.memory_space<vmem>>, vector<1x8xf32>,
    return
  }
  func.func @transform_0(%arg0: i32) -> (i32, i32) {
    %c0_i32 = arith.constant 0 : i32
    %c0_i32_0 = arith.constant 0 : i32
    return %c0_i32, %arg0 : i32, i32
  }
  func.func @transform_1(%arg0: i32) -> (i32, i32) {
    %c0_i32 = arith.constant 0 : i32
    %c0_i32_0 = arith.constant 0 : i32
    %c0_i32_1 = arith.constant 0 : i32
    return %c0_i32, %c0_i32_0 : i32, i32
  }
  func.func @transform_2(%arg0: i32) -> (i32, i32) {
    %c0_i32 = arith.constant 0 : i32
    %c0_i32_0 = arith.constant 0 : i32
    %c0_i32_1 = arith.constant 0 : i32
    return %c0_i32, %c0_i32_0 : i32, i32
  }
  func.func @transform_3(%arg0: i32) -> (i32, i32) {
    %c0_i32 = arith.constant 0 : i32
    %c0_i32_0 = arith.constant 0 : i32
    %c0_i32_1 = arith.constant 0 : i32
    return %c0_i32, %c0_i32_0 : i32, i32
  }
  func.func @transform_4(%arg0: i32) -> i32 {
    %c0_i32 = arith.constant 0 : i32
    %c0_i32_0 = arith.constant 0 : i32
    return %c0_i32 : i32
  }
  func.func @transform_5(%arg0: i32) -> (i32, i32) {
    %c0_i32 = arith.constant 0 : i32
    %c0_i32_0 = arith.constant 0 : i32
    return %c0_i32, %arg0 : i32, i32
  }
}

</mosaic_0001>

<bundles_post_ra>
// kernel: tpu_custom_call.1
= control target key start
LH: loop header
LB: loop body
LE: loop exit
PB: predicated region body
PF: predicated region fallthrough
CT: control target
= control target key end

     0   :  { %v269_v3 = vmov 0   ;;  %s349_s0 = inlined_call_operand.vmem [shape: f32[4,8], index: 0, kind: input, shape index: {}]   ;;  %s350_s1 = inlined_call_operand.vmem [shape: f32[32,4], index: 1, kind: input, shape index: {}]   ;;  %s351_s2 = inlined_call_operand.vmem [shape: f32[32,1], index: 2, kind: input, shape index: {}]   ;;  %s352_s3 = inlined_call_operand.vmem [shape: f32[32,1], index: 3, kind: input, shape index: {}]   ;;  %s353_s4 = inlined_call_operand.<no memory space> [shape: f32[1], index: 4, kind: input, shape index: {}]   ;;  %s354_s5 = inlined_call_operand.hbm [shape: f32[1,8], index: 5, kind: output, shape index: {}]  }
   0x1   :  { %v27_v0 = vld [vmem:[%s351_s2] sm:$0xff]  ;;  %v25_v1 = vld [vmem:[%s350_s1 + $0x10] sm:$0xff]  ;;  %229 = vset.pattern.permute.xlu2 %v269_v3  ;;  %228 = vset.pattern.permute.xlu1 %v269_v3 }
   0x2   :  { %v23_v2 = vld [vmem:[%s350_s1] sm:$0xff]  ;;  %227 = vset.pattern.permute.xlu0 %v269_v3  ;;  %58 = vperm.xlu2 %229, %v27_v0  }
   0x3   :  { %11 = vsyncpa [#allocation4], 0  ;;  %43 = vperm.xlu1 %228, %v25_v1   ;;  %33 = vperm.xlu0 %227, %v23_v2   ;;  %v28_v4 = vld [vmem:[%s351_s2 + $0x8] sm:$0xff]  ;;  %v26_v5 = vld [vmem:[%s350_s1 + $0x18] sm:$0xff]  ;;  %v270_v9 = vmov 1   ;;  %v271_v10 = vmov 2  }
   0x4   :  { %v24_v6 = vld [vmem:[%s350_s1 + $0x8] sm:$0xff]  ;;  %v30_v7 = vld [vmem:[%s351_s2 + $0x18] sm:$0xff]  ;;  %v29_v8 = vld [vmem:[%s351_s2 + $0x10] sm:$0xff]  ;;  %v272_v11 = vmov 3   ;;  %vm187_vm0 = vcmask 64512   ;;  %s273_s17 = smov [#allocation3]  }
   0x5   :  { %v160_v12 = vld [vmem:[%s352_s3 + $0x8] sm:$0xff]  ;;  %v159_v13 = vld [vmem:[%s352_s3] sm:$0xff]  ;;  %v161_v14 = vld [vmem:[%s352_s3 + $0x10] sm:$0xff]  ;;  %s211_s18 = sshll.u32 %s273_s17, 4  ;;  %s213_s21 = sshll.u32 %s354_s5, 4  ;;  %vm204_vm1 = vcmask 57344   ;;  %s212_s18 = int_to_ptr.vmem [resolvable:$true] %s211_s18  ;;  %s214_s21 = int_to_ptr.hbm [resolvable:$true] %s213_s21 }
   0x6   :  { %v162_v15 = vld [vmem:[%s352_s3 + $0x18] sm:$0xff]  ;;  %v22_v30 = vld [vmem:[%s349_s0] sm:$0xf] }
   0x7   :  { %v51_v32 = vperm.slane %v22_v30, 0  ;;  %v96_v34 = vperm.slane %v22_v30, 1  ;;  %v121_v37 = vperm.slane %v22_v30, 2  ;;  %v146_v46 = vperm.slane %v22_v30, 3 }
   0xa   :  { %63 = vperm.xlu2 %229, %v28_v4  }
   0xb   :  { %48 = vperm.xlu1 %228, %v26_v5   ;;  %38 = vperm.xlu0 %227, %v24_v6  }
  0x12   :  { %230 = vset.pattern.permute.xlu2 %v270_v9 }
  0x13   :  { %73 = vperm.xlu1 %228, %v30_v7   ;;  %68 = vperm.xlu0 %227, %v29_v8  }
  0x14   :  { %81 = vperm.xlu2 %230, %v23_v2  }
  0x1b   :  { %232 = vset.pattern.permute.xlu1 %v270_v9  ;;  %231 = vset.pattern.permute.xlu0 %v270_v9 }
  0x1c   :  { %89 = vperm.xlu1 %232, %v25_v1   ;;  %93 = vperm.xlu2 %230, %v26_v5  }
  0x1d   :  { %85 = vperm.xlu0 %231, %v24_v6  }
  0x24   :  { %233 = vset.pattern.permute.xlu1 %v271_v10  ;;  %234 = vset.pattern.permute.xlu2 %v271_v10 }
  0x25   :  { %235 = vset.pattern.permute.xlu0 %v271_v10  ;;  %106 = vperm.xlu1 %233, %v23_v2  }
  0x26   :  { %110 = vperm.xlu2 %234, %v24_v6   ;;  %114 = vperm.xlu0 %235, %v25_v1  }
  0x2d   :  { %236 = vset.pattern.permute.xlu1 %v272_v11 }
  0x2e   :  { %237 = vset.pattern.permute.xlu2 %v272_v11  ;;  %131 = vperm.xlu1 %236, %v23_v2  }
  0x2f   :  { %135 = vperm.xlu2 %237, %v24_v6   ;;  %239 = vset.pattern.permute.xlu0 %v272_v11 }
  0x30   :  { %143 = vperm.xlu0 %239, %v26_v5  }
  0x36   :  { %238 = vset.pattern.permute.xlu1 %v271_v10 }
  0x37   :  { %139 = vperm.xlu2 %237, %v25_v1   ;;  %118 = vperm.xlu1 %238, %v26_v5  }
  0x38   :  { %242 = vset.pattern.permute.xlu0 %v269_v3 }
  0x3f   :  { %241 = vset.pattern.permute.xlu2 %v269_v3  ;;  %240 = vset.pattern.permute.xlu1 %v269_v3 }
  0x40   :  { %170 = vperm.xlu2 %241, %v160_v12   ;;  %165 = vperm.xlu1 %240, %v159_v13  }
  0x48   :  { %175 = vperm.xlu1 %240, %v161_v14   ;;  %180 = vperm.xlu2 %241, %v162_v15  }
  0x5c   :  { %v59_v16 = vpop.permute.xlu2 %58 }
  0x64   :  { %v64_v17 = vpop.permute.xlu2 %63 }
  0x6e   :  { %v82_v21 = vpop.permute.xlu2 %81 }
  0x6f   :  { %v97_v41 = vmul.f32 %v96_v34, %v82_v21 }
  0x75   :  { %v44_v18 = vpop.permute.xlu1 %43  ;;  %v34_v19 = vpop.permute.xlu0 %33 }
  0x76   :  { %v94_v24 = vpop.permute.xlu2 %93  ;;  %v52_v36 = vmul.f32 %v51_v32, %v34_v19  ;;  %v54_v52 = vmul.f32 %v51_v32, %v44_v18 }
  0x77   :  { %v100_v48 = vmul.f32 %v96_v34, %v94_v24 }
  0x78   :  { %v76_v42 = vadd.f32 %v59_v16, %v52_v36 }
  0x7a   :  { %v101_v54 = vadd.f32 %v97_v41, %v76_v42 }
  0x7d   :  { %v49_v20 = vpop.permute.xlu1 %48  ;;  %v39_v23 = vpop.permute.xlu0 %38 }
  0x7e   :  { %v53_v35 = vmul.f32 %v51_v32, %v39_v23  ;;  %v55_v44 = vmul.f32 %v51_v32, %v49_v20 }
  0x80   :  { %v111_v27 = vpop.permute.xlu2 %110  ;;  %v77_v40 = vadd.f32 %v64_v17, %v53_v35 }
  0x81   :  { %v123_v45 = vmul.f32 %v121_v37, %v111_v27 }
  0x85   :  { %v74_v22 = vpop.permute.xlu1 %73  ;;  %v69_v26 = vpop.permute.xlu0 %68 }
  0x86   :  { %v79_v49 = vadd.f32 %v74_v22, %v55_v44  ;;  %v78_v59 = vadd.f32 %v69_v26, %v54_v52 }
  0x88   :  { %v104_v61 = vadd.f32 %v100_v48, %v79_v49 }
  0x89   :  { %v136_v31 = vpop.permute.xlu2 %135 }
  0x8a   :  { %v148_v55 = vmul.f32 %v146_v46, %v136_v31 }
  0x8e   :  { %v90_v25 = vpop.permute.xlu1 %89 }
  0x8f   :  { %v86_v29 = vpop.permute.xlu0 %85  ;;  %v99_v53 = vmul.f32 %v96_v34, %v90_v25 }
  0x90   :  { %v98_v38 = vmul.f32 %v96_v34, %v86_v29 }
  0x91   :  { %v140_v43 = vpop.permute.xlu2 %139  ;;  %v103_v0 = vadd.f32 %v99_v53, %v78_v59 }
  0x92   :  { %v102_v47 = vadd.f32 %v98_v38, %v77_v40  ;;  %v149_v6 = vmul.f32 %v146_v46, %v140_v43 }
  0x94   :  { %v127_v56 = vadd.f32 %v123_v45, %v102_v47 }
  0x96   :  { %v152_v1 = vadd.f32 %v148_v55, %v127_v56 }
  0x97   :  { %v107_v28 = vpop.permute.xlu1 %106 }
  0x98   :  { %v115_v39 = vpop.permute.xlu0 %114  ;;  %v122_v50 = vmul.f32 %v121_v37, %v107_v28  ;;  %v156_v9 = vmax.f32 %v152_v1, 0.0 }
  0x99   :  { %v124_v63 = vmul.f32 %v121_v37, %v115_v39 }
  0x9a   :  { %v126_v62 = vadd.f32 %v122_v50, %v101_v54  ;;  %v171_v5 = vpop.permute.xlu2 %170 }
  0x9b   :  { %v128_v7 = vadd.f32 %v124_v63, %v103_v0  ;;  %v184_v14 = vmul.f32 %v171_v5, %v156_v9 }
  0x9d   :  { %v153_v13 = vadd.f32 %v149_v6, %v128_v7  ;;  %v189_v20 = vsel %vm187_vm0, %v184_v14, 0.0 }
  0x9f   :  { %v157_v18 = vmax.f32 %v153_v13, 0.0 }
  0xa0   :  { %v132_v33 = vpop.permute.xlu1 %131 }
  0xa1   :  { %v147_v57 = vmul.f32 %v146_v46, %v132_v33  ;;  %v202_v33 = vstv %s353_s4 }
  0xa2   :  { %v144_v60 = vpop.permute.xlu0 %143  ;;  %v181_v16 = vpop.permute.xlu2 %180 }
  0xa3   :  { %v151_v2 = vadd.f32 %v147_v57, %v126_v62  ;;  %v150_v4 = vmul.f32 %v146_v46, %v144_v60 }
  0xa5   :  { %v155_v11 = vmax.f32 %v151_v2, 0.0 }
  0xa9   :  { %v119_v51 = vpop.permute.xlu1 %118 }
  0xaa   :  { %v125_v58 = vmul.f32 %v121_v37, %v119_v51 }
  0xac   :  { %v129_v3 = vadd.f32 %v125_v58, %v104_v61 }
  0xae   :  { %v154_v10 = vadd.f32 %v150_v4, %v129_v3 }
  0xb0   :  { %v158_v15 = vmax.f32 %v154_v10, 0.0 }
  0xb2   :  { %v166_v8 = vpop.permute.xlu1 %165  ;;  %v186_v21 = vmul.f32 %v181_v16, %v158_v15 }
  0xb3   :  { %v183_v12 = vmul.f32 %v166_v8, %v155_v11 }
  0xb4   :  { %v193_v26 = vsel %vm187_vm0, %v186_v21, 0.0 }
  0xb5   :  { %v188_v17 = vsel %vm187_vm0, %v183_v12, 0.0 }
  0xb6   :  { %v190_v23 = vadd.f32 %v189_v20, %v188_v17 }
  0xba   :  { %v176_v19 = vpop.permute.xlu1 %175 }
  0xbb   :  { %v185_v22 = vmul.f32 %v176_v19, %v157_v18 }
  0xbd   :  { %v191_v24 = vsel %vm187_vm0, %v185_v22, 0.0 }
  0xbe   :  { %v192_v25 = vadd.f32 %v191_v24, %v190_v23 }
  0xc0   :  { %v194_v27 = vadd.f32 %v193_v26, %v192_v25 }
  0xc2   :  { %v195_v28 = vrot.slane %v194_v27, 4 }
  0xc4   :  { %v196_v29 = vadd.f32 %v195_v28, %v194_v27 }
  0xc6   :  { %v197_v30 = vrot.slane %v196_v29, 2 }
  0xc8   :  { %v198_v31 = vadd.f32 %v197_v30, %v196_v29 }
  0xca   :  { %v199_v32 = vrot.slane %v198_v31, 1 }
  0xcc   :  { %v200_v34 = vadd.f32 %v199_v32, %v198_v31 }
  0xce   :  { %v203_v35 = vadd.f32 %v202_v33, %v200_v34 }
  0xd0   :  { %205 = vst.msk [vmem:[#allocation3] sm:$0x1] %vm204_vm1, %v203_v35 }
  0xd1   :  { %216 = dma.vmem_to_hbm [thread:$0]  %s212_s18, 16, %s214_s21, [#allocation4]  }
  0xd2   :  { %267 = dma.done.wait [#allocation4], 16  }
  0xd3   :  { %268 = vsyncadd [#allocation4], 4294967280 }
  0xd4   :  { %221 = vsyncpa [#allocation4], 1 }

</bundles_post_ra>
